<compile_context>
chip_gen: v6e
topology: v6e:2x2x1
jax: 0.10.0
libtpu: 0.0.40
codegen_flags: <defaults>
</compile_context>

<pallas_src>
import jax
import jax.numpy as jnp
from jax.experimental import pallas as pl
from jax.experimental.pallas import tpu as pltpu

_LANES = 128
_SUBLANES = 8
# (4096, 128) f32 block = 2 MiB per input per pipeline buffer.
_MAX_BLOCK_ROWS = 4096


def _make_dice_kernel(block_rows, rows_in_last_block):
    """Builds the kernel; block_rows / rows_in_last_block are trace-time ints."""
    needs_mask = rows_in_last_block != block_rows
    groups = block_rows // _SUBLANES

    def kernel(x_ref, t_ref, out_ref, inter_acc, den_acc):
        step = pl.program_id(0)
        last = pl.num_programs(0) - 1

        @pl.when(step == 0)
        def _init():
            inter_acc[...] = jnp.zeros_like(inter_acc)
            den_acc[...] = jnp.zeros_like(den_acc)

        # In-kernel upcast: callers may pass bf16 logits / bf16 targets and the
        # HBM-bound kernel streams the narrower byte count.
        x = x_ref[...].astype(jnp.float32)
        t = t_ref[...].astype(jnp.float32)
        p = jax.nn.sigmoid(x)
        pt = p * t          # intersection terms
        dn = p + t          # inputs.sum() + targets.sum() terms

        def accumulate(pt_blk, dn_blk):
            # Block-local VPU reduction down to one (8, 128) vreg tile each:
            # trailing (8, 128) matches the vreg layout, so the sum over the
            # leading axis is pure elementwise adds (no XLU), and the
            # persistent accumulators are 2 x 4 KiB instead of block-sized.
            inter_acc[...] += pt_blk.reshape(groups, _SUBLANES, _LANES).sum(axis=0)
            den_acc[...] += dn_blk.reshape(groups, _SUBLANES, _LANES).sum(axis=0)

        if needs_mask:
            # Only the final grid block can overhang the array; gate the mask
            # there so every other step stays unmasked on the HBM roofline.
            @pl.when(step < last)
            def _full_block():
                accumulate(pt, dn)

            @pl.when(step == last)
            def _ragged_block():
                # Compare local row indices against the remaining row count
                # (no 32-bit global element index -> no overflow hazard).
                row = jax.lax.broadcasted_iota(jnp.int32, pt.shape, 0)
                valid = row < rows_in_last_block
                accumulate(jnp.where(valid, pt, 0.0), jnp.where(valid, dn, 0.0))
        else:
            accumulate(pt, dn)

        @pl.when(step == last)
        def _finalize():
            # Exactly one cross-lane/sublane (XLU) reduction for the kernel.
            out_ref[0] = jnp.sum(inter_acc[...])
            out_ref[1] = jnp.sum(den_acc[...])

    return kernel


def dice_loss(inputs, targets, smooth=1.0, max_block_rows=_MAX_BLOCK_ROWS):
    """Pallas TPU implementation of DiceLoss.forward."""
    x = jnp.reshape(inputs, (-1,))
    t = jnp.reshape(targets, (-1,))
    n = x.shape[0]

    # Rows handled by the Pallas kernel: the (8 * 128)-aligned prefix.  The
    # small remainder goes through a plain-JAX epilogue, so no full-tensor
    # pad / copy is made in the wrapper for ragged sizes.
    main_rows = (n // (_SUBLANES * _LANES)) * _SUBLANES
    main_n = main_rows * _LANES

    inter = jnp.float32(0.0)
    den = jnp.float32(0.0)

    if main_rows > 0:
        # Keep the block row count a positive multiple of 8 (sublane tiling).
        cap = max(_SUBLANES, (int(max_block_rows) // _SUBLANES) * _SUBLANES)
        block_rows = int(min(main_rows, cap))
        steps = pl.cdiv(main_rows, block_rows)
        rows_in_last_block = main_rows - (steps - 1) * block_rows

        x2 = x[:main_n].reshape(main_rows, _LANES)
        t2 = t[:main_n].reshape(main_rows, _LANES)

        partial = pl.pallas_call(
            _make_dice_kernel(block_rows, rows_in_last_block),
            out_shape=jax.ShapeDtypeStruct((2,), jnp.float32),
            grid_spec=pltpu.PrefetchScalarGridSpec(
                num_scalar_prefetch=0,
                grid=(steps,),
                in_specs=[
                    pl.BlockSpec((block_rows, _LANES), lambda i: (i, 0)),
                    pl.BlockSpec((block_rows, _LANES), lambda i: (i, 0)),
                ],
                out_specs=pl.BlockSpec(memory_space=pltpu.MemorySpace.SMEM),
                scratch_shapes=[
                    pltpu.VMEM((_SUBLANES, _LANES), jnp.float32),
                    pltpu.VMEM((_SUBLANES, _LANES), jnp.float32),
                ],
            ),
            compiler_params=pltpu.CompilerParams(
                dimension_semantics=("arbitrary",),  # sequential accumulation
            ),
        )(x2, t2)
        inter = inter + partial[0]
        den = den + partial[1]

    if main_n < n:
        # Tiny ragged tail (< 8*128 + 128 elements): plain-JAX epilogue.
        xt = x[main_n:].astype(jnp.float32)
        tt = t[main_n:].astype(jnp.float32)
        pt_ = jax.nn.sigmoid(xt)
        inter = inter + jnp.sum(pt_ * tt)
        den = den + jnp.sum(pt_) + jnp.sum(tt)

    smooth = jnp.float32(smooth)
    dice = (2.0 * inter + smooth) / (den + smooth)
    return 1.0 - dice


def _dice_loss_ref(inputs, targets, smooth=1.0):
    p = jax.nn.sigmoid(inputs.astype(jnp.float32)).reshape(-1)
    t = targets.astype(jnp.float32).reshape(-1)
    inter = jnp.sum(p * t)
    dice = (2.0 * inter + smooth) / (jnp.sum(p) + jnp.sum(t) + smooth)
    return 1.0 - dice


if __name__ == "__main__":
    key = jax.random.PRNGKey(0)
    k1, k2, k3, k4 = jax.random.split(key, 4)

    # NCHW segmentation logits / binary mask (lane-aligned fast path).
    x = jax.random.normal(k1, (2, 4, 16, 16), dtype=jnp.float32)
    t = (jax.random.uniform(k2, (2, 4, 16, 16)) > 0.5).astype(jnp.float32)

    out = jax.block_until_ready(dice_loss(x, t))
    ref = _dice_loss_ref(x, t)
    assert jnp.allclose(out, ref, atol=1e-5, rtol=1e-5), (out, ref)

    # Multi-step grid: accumulators carried across grid steps.
    out_ms = jax.block_until_ready(dice_loss(x, t, max_block_rows=8))
    assert jnp.allclose(out_ms, ref, atol=1e-5, rtol=1e-5), (out_ms, ref)

    # bf16 logits / mask: in-kernel upcast, half the HBM bytes streamed.
    xb = x.astype(jnp.bfloat16)
    tb = t.astype(jnp.bfloat16)
    out_bf = jax.block_until_ready(dice_loss(xb, tb))
    ref_bf = _dice_loss_ref(xb, tb)
    assert jnp.allclose(out_bf, ref_bf, atol=1e-4, rtol=1e-4), (out_bf, ref_bf)

    # Ragged size (n = 3122): masked final block + plain-JAX tail epilogue.
    xr = jax.random.normal(k3, (2, 7, 223), dtype=jnp.float32)
    tr = (jax.random.uniform(k4, (2, 7, 223)) > 0.5).astype(jnp.float32)
    out_r = jax.block_until_ready(dice_loss(xr, tr, max_block_rows=16))
    ref_r = _dice_loss_ref(xr, tr)
    assert jnp.allclose(out_r, ref_r, atol=1e-5, rtol=1e-5), (out_r, ref_r)

    print("KERNEL_OK")
</pallas_src>

<mosaic_0001>
module attributes {stable_mosaic.version = 11 : i64} {
  func.func @kernel(%arg0: i32, %arg1: memref<16x128xf32, #tpu.memory_space<vmem>>, %arg2: memref<16x128xf32, #tpu.memory_space<vmem>>, %arg3: memref<2xf32, #tpu.memory_space<smem>>, %arg4: memref<8x128xf32, #tpu.memory_space<vmem>>, %arg5: memref<8x128xf32, #tpu.memory_space<vmem>>) attributes {dimension_semantics = [#tpu.dimension_semantics<arbitrary>], iteration_bounds = array<i64: 1>, scalar_prefetch = 0 : i64, scratch_operands = 2 : i64, tpu.core_type = #tpu.core_type<tc>, window_params = [{transform_indices = @transform_0, window_bounds = array<i64: 16, 128>}, {transform_indices = @transform_1, window_bounds = array<i64: 16, 128>}, {transform_indices = @transform_2, window_bounds = array<i64: 2>}]} {
    %c0_i32 = arith.constant 0 : i32
    %0 = arith.cmpi eq, %arg0, %c0_i32 : i32
    %1 = arith.extui %0 : i1 to i32
    %c0_i32_0 = arith.constant 0 : i32
    %2 = arith.cmpi ne, %1, %c0_i32_0 : i32
    scf.if %2 {
      %cst_16 = arith.constant 0.000000e+00 : f32
      %25 = vector.broadcast %cst_16 : f32 to vector<8x128xf32>
      %c0_17 = arith.constant 0 : index
      %c0_18 = arith.constant 0 : index
      %26 = vector.load %arg4[%c0_17, %c0_18] : memref<8x128xf32, #tpu.memory_space<vmem>>, vector<8x128xf32>
      tpu.vector_store %arg4[%c0_17, %c0_18], %25 {strides = array<i32>} : memref<8x128xf32, #tpu.memory_space<vmem>>, vector<8x128xf32>,
      %cst_19 = arith.constant 0.000000e+00 : f32
      %27 = vector.broadcast %cst_19 : f32 to vector<8x128xf32>
      %c0_20 = arith.constant 0 : index
      %c0_21 = arith.constant 0 : index
      %28 = vector.load %arg5[%c0_20, %c0_21] : memref<8x128xf32, #tpu.memory_space<vmem>>, vector<8x128xf32>
      tpu.vector_store %arg5[%c0_20, %c0_21], %27 {strides = array<i32>} : memref<8x128xf32, #tpu.memory_space<vmem>>, vector<8x128xf32>,
    } else {
    }
    %c0 = arith.constant 0 : index
    %c0_1 = arith.constant 0 : index
    %3 = vector.load %arg1[%c0, %c0_1] : memref<16x128xf32, #tpu.memory_space<vmem>>, vector<16x128xf32>
    %c0_2 = arith.constant 0 : index
    %c0_3 = arith.constant 0 : index
    %4 = vector.load %arg2[%c0_2, %c0_3] : memref<16x128xf32, #tpu.memory_space<vmem>>, vector<16x128xf32>
    %5 = arith.negf %3 : vector<16x128xf32>
    %6 = math.exp %5 : vector<16x128xf32>
    %cst = arith.constant 1.000000e+00 : f32
    %7 = vector.broadcast %cst : f32 to vector<16x128xf32>
    %8 = arith.addf %7, %6 : vector<16x128xf32>
    %9 = arith.divf %7, %8 : vector<16x128xf32>
    %10 = arith.mulf %9, %4 : vector<16x128xf32>
    %11 = arith.addf %9, %4 : vector<16x128xf32>
    %c0_4 = arith.constant 0 : index
    %c0_5 = arith.constant 0 : index
    %12 = vector.load %arg4[%c0_4, %c0_5] : memref<8x128xf32, #tpu.memory_space<vmem>>, vector<8x128xf32>
    %13 = vector.shape_cast %10 : vector<16x128xf32> to vector<2x8x128xf32>
    %cst_6 = arith.constant dense<0.000000e+00> : vector<8x128xf32>
    %14 = vector.multi_reduction <add>, %13, %cst_6 [0] : vector<2x8x128xf32> to vector<8x128xf32>
    %15 = arith.addf %12, %14 : vector<8x128xf32>
    %c0_7 = arith.constant 0 : index
    %c0_8 = arith.constant 0 : index
    %16 = vector.load %arg4[%c0_7, %c0_8] : memref<8x128xf32, #tpu.memory_space<vmem>>, vector<8x128xf32>
    tpu.vector_store %arg4[%c0_7, %c0_8], %15 {strides = array<i32>} : memref<8x128xf32, #tpu.memory_space<vmem>>, vector<8x128xf32>,
    %c0_9 = arith.constant 0 : index
    %c0_10 = arith.constant 0 : index
    %17 = vector.load %arg5[%c0_9, %c0_10] : memref<8x128xf32, #tpu.memory_space<vmem>>, vector<8x128xf32>
    %18 = vector.shape_cast %11 : vector<16x128xf32> to vector<2x8x128xf32>
    %cst_11 = arith.constant dense<0.000000e+00> : vector<8x128xf32>
    %19 = vector.multi_reduction <add>, %18, %cst_11 [0] : vector<2x8x128xf32> to vector<8x128xf32>
    %20 = arith.addf %17, %19 : vector<8x128xf32>
    %c0_12 = arith.constant 0 : index
    %c0_13 = arith.constant 0 : index
    %21 = vector.load %arg5[%c0_12, %c0_13] : memref<8x128xf32, #tpu.memory_space<vmem>>, vector<8x128xf32>
    tpu.vector_store %arg5[%c0_12, %c0_13], %20 {strides = array<i32>} : memref<8x128xf32, #tpu.memory_space<vmem>>, vector<8x128xf32>,
    %c0_i32_14 = arith.constant 0 : i32
    %22 = arith.cmpi eq, %arg0, %c0_i32_14 : i32
    %23 = arith.extui %22 : i1 to i32
    %c0_i32_15 = arith.constant 0 : i32
    %24 = arith.cmpi ne, %23, %c0_i32_15 : i32
    scf.if %24 {
      %c0_16 = arith.constant 0 : index
      %c0_17 = arith.constant 0 : index
      %25 = vector.load %arg4[%c0_16, %c0_17] : memref<8x128xf32, #tpu.memory_space<vmem>>, vector<8x128xf32>
      %26 = vector.shape_cast %25 : vector<8x128xf32> to vector<1x8x128xf32>
      %cst_18 = arith.constant dense<0.000000e+00> : vector<1xf32>
      %27 = vector.multi_reduction <add>, %26, %cst_18 [1, 2] : vector<1x8x128xf32> to vector<1xf32>
      %28 = vector.shape_cast %27 : vector<1xf32> to vector<1x1x1xf32>
      %29 = vector.extract %28[0, 0, 0] : f32 from vector<1x1x1xf32>
      %c0_19 = arith.constant 0 : index
      %30 = memref.load %arg3[%c0_19] : memref<2xf32, #tpu.memory_space<smem>>
      memref.store %29, %arg3[%c0_19] : memref<2xf32, #tpu.memory_space<smem>>
      %c0_20 = arith.constant 0 : index
      %c0_21 = arith.constant 0 : index
      %31 = vector.load %arg5[%c0_20, %c0_21] : memref<8x128xf32, #tpu.memory_space<vmem>>, vector<8x128xf32>
      %32 = vector.shape_cast %31 : vector<8x128xf32> to vector<1x8x128xf32>
      %cst_22 = arith.constant dense<0.000000e+00> : vector<1xf32>
      %33 = vector.multi_reduction <add>, %32, %cst_22 [1, 2] : vector<1x8x128xf32> to vector<1xf32>
      %34 = vector.shape_cast %33 : vector<1xf32> to vector<1x1x1xf32>
      %35 = vector.extract %34[0, 0, 0] : f32 from vector<1x1x1xf32>
      %c1 = arith.constant 1 : index
      %36 = memref.load %arg3[%c1] : memref<2xf32, #tpu.memory_space<smem>>
      memref.store %35, %arg3[%c1] : memref<2xf32, #tpu.memory_space<smem>>
    } else {
    }
    return
  }
  func.func @transform_0(%arg0: i32) -> (i32, i32) {
    %c0_i32 = arith.constant 0 : i32
    %c0_i32_0 = arith.constant 0 : i32
    return %arg0, %c0_i32 : i32, i32
  }
  func.func @transform_1(%arg0: i32) -> (i32, i32) {
    %c0_i32 = arith.constant 0 : i32
    %c0_i32_0 = arith.constant 0 : i32
    return %arg0, %c0_i32 : i32, i32
  }
  func.func @transform_2(%arg0: i32) -> i32 {
    %c0_i32 = arith.constant 0 : i32
    %c0_i32_0 = arith.constant 0 : i32
    return %c0_i32 : i32
  }
}

</mosaic_0001>

<bundles_post_ra>
// kernel: tpu_custom_call.1
= control target key start
LH: loop header
LB: loop body
LE: loop exit
PB: predicated region body
PF: predicated region fallthrough
CT: control target
= control target key end

     0   :  { %7 = vsyncpa [#allocation5], 0  ;;  %s218_s0 = inlined_call_operand.hbm [shape: f32[16,128], index: 0, kind: input, shape index: {}]   ;;  %s219_s1 = inlined_call_operand.hbm [shape: f32[16,128], index: 1, kind: input, shape index: {}]   ;;  %s220_s2 = inlined_call_operand.hbm [shape: f32[2], index: 2, kind: output, shape index: {}]  }
   0x1   :  { %8 = vsyncpa [#allocation8], 0 }
   0x2   :  { %9 = vsyncpa [#allocation6], 0  ;;  %s189_s9 = smov [#allocation4]  }
   0x3   :  { %s15_s10 = sshll.u32 %s189_s9, 4  ;;  %s16_s10 = int_to_ptr.vmem [resolvable:$true] %s15_s10 }
   0x4   :  { %s143_s11 = scalar_lea.vmem %s16_s10, 256  ;;  %p148_p1 = scmp.lt.s32.totalorder %s16_s10, %s16_s10 }
   0x5   :  { %p144_p0 = scmp.ne.s32.totalorder %s16_s10, %s143_s11  ;;  %p149_p2 = scmp.lt.s32.totalorder %s143_s11, %s143_s11 }
   0x7   :  { %p150_p3 = por %p149_p2, %p148_p1 }
   0x9   :  { %p151_p4 = pnand %p150_p3, %p144_p0 }
   0xb   :  { %154 = shalt.err (!%p151_p4)
}
   0xc   :  { %s190_s12 = smov 128   ;;  %s191_s13 = smov 8  }
   0xd   :  { %21 = dma.hbm_to_vmem [thread:$0]  %s218_s0, 256, %s16_s10, [#allocation5], %s190_s12, %s190_s12, %s191_s13  }
   0xe   :  { %s192_s16 = smov [#allocation7]  }
   0xf   :  { %s27_s17 = sshll.u32 %s192_s16, 4  ;;  %s28_s17 = int_to_ptr.vmem [resolvable:$true] %s27_s17 }
  0x10   :  { %s163_s18 = scalar_lea.vmem %s28_s17, 256  ;;  %p168_p6 = scmp.lt.s32.totalorder %s28_s17, %s28_s17 }
  0x11   :  { %p164_p5 = scmp.ne.s32.totalorder %s28_s17, %s163_s18  ;;  %p169_p7 = scmp.lt.s32.totalorder %s163_s18, %s163_s18 }
  0x13   :  { %p170_p8 = por %p169_p7, %p168_p6 }
  0x15   :  { %p171_p9 = pnand %p170_p8, %p164_p5 }
  0x17   :  { %174 = shalt.err (!%p171_p9)
}
  0x18   :  { %33 = dma.hbm_to_vmem [thread:$0]  %s219_s1, 256, %s28_s17, [#allocation8], %s190_s12, %s190_s12, %s191_s13  }
  0x19   :  { %183 = dma.done.wait [#allocation5], 256  }
  0x1a   :  { %184 = vsyncadd [#allocation5], 4294967040 }
  0x1b   :  { %185 = dma.done.wait [#allocation8], 256  }
  0x1c   :  { %186 = vsyncadd [#allocation8], 4294967040  ;;  %v46_v0 = vld [vmem:[#allocation4] sm:$0xff]  ;;  %v47_v1 = vld [vmem:[#allocation4 + $0x8] sm:$0xff]  ;;  %s193_s21 = smov [#allocation9]  }
  0x1d   :  { %v116_v2 = vmul.f32 -1.442695, %v46_v0  ;;  %v117_v3 = vmul.f32 -1.442695, %v47_v1  ;;  %v48_v8 = vld [vmem:[#allocation7] sm:$0xff]  ;;  %v49_v9 = vld [vmem:[#allocation7 + $0x8] sm:$0xff] }
  0x1f   :  { %127 = vpow2.f32 %v116_v2 }
  0x20   :  { %129 = vpow2.f32 %v117_v3 }
  0x2c   :  { %v128_v4 = vpop.eup %127 }
  0x2d   :  { %v130_v5 = vpop.eup %129  ;;  %v56_v6 = vadd.f32 1.0, %v128_v4 }
  0x2e   :  { %v57_v7 = vadd.f32 1.0, %v130_v5 }
  0x2f   :  { %131 = vrcp.f32 %v56_v6 }
  0x30   :  { %133 = vrcp.f32 %v57_v7 }
  0x3c   :  { %v132_v10 = vpop.eup %131 }
  0x3d   :  { %v134_v11 = vpop.eup %133  ;;  %v62_v12 = vmul.f32 %v132_v10, %v48_v8  ;;  %v64_v14 = vadd.f32 %v132_v10, %v48_v8 }
  0x3e   :  { %v63_v13 = vmul.f32 %v134_v11, %v49_v9  ;;  %v65_v15 = vadd.f32 %v134_v11, %v49_v9 }
  0x40   :  { %v67_v16 = vadd.f32 %v63_v13, %v62_v12  ;;  %v71_v17 = vadd.f32 %v65_v15, %v64_v14 }
  0x42   :  { %78 = vadd.xlane.f32.xlu0 %v67_v16 }
  0x46   :  { %90 = vadd.xlane.f32.xlu0 %v71_v17 }
  0xcb   :  { %v79_v18 = vpop.xlane.xlu0 %78 }
  0xcc   :  { %v80_v19 = vrot.slane %v79_v18, 4 }
  0xce   :  { %v81_v20 = vadd.f32 %v80_v19, %v79_v18 }
  0xcf   :  { %v91_v21 = vpop.xlane.xlu0 %90 }
  0xd0   :  { %v82_v22 = vrot.slane %v81_v20, 2  ;;  %v92_v23 = vrot.slane %v91_v21, 4 }
  0xd2   :  { %v93_v24 = vadd.f32 %v92_v23, %v91_v21  ;;  %v83_v25 = vadd.f32 %v82_v22, %v81_v20 }
  0xd4   :  { %v94_v26 = vrot.slane %v93_v24, 2  ;;  %v84_v27 = vrot.slane %v83_v25, 1 }
  0xd6   :  { %v95_v28 = vadd.f32 %v94_v26, %v93_v24  ;;  %v85_v29 = vadd.f32 %v84_v27, %v83_v25 }
  0xd8   :  { %118 = vpush %v85_v29  ;;  %v96_v30 = vrot.slane %v95_v28, 1 }
  0xda   :  { %v97_v31 = vadd.f32 %v96_v30, %v95_v28 }
  0xdc   :  { %120 = vpush %v97_v31 }
 0x109   :  { %s119_s0 = spop %118 }
 0x10a   :  { %88 = sst [smem:[#allocation9]] %s119_s0 }
 0x10d   :  { %s121_s1 = spop %120 }
 0x10e   :  { %100 = sst [smem:[#allocation9 + $0x1]] %s121_s1 }
 0x10f   :  { %108 = dma.smem_to_hbm %s193_s21, 16, %s220_s2, [#allocation6]  }
 0x110   :  { %187 = dma.done.wait [#allocation6], 16  }
 0x111   :  { %188 = vsyncadd [#allocation6], 4294967280 }
 0x112   :  { %112 = sfence }
 0x113   :  { %113 = vsyncpa [#allocation5], 1 }
 0x114   :  { %114 = vsyncpa [#allocation8], 1 }
 0x115   :  { %115 = vsyncpa [#allocation6], 1 }

</bundles_post_ra>
